<compile_context>
chip_gen: v6e
topology: v6e:2x2x1
jax: 0.10.0
libtpu: 0.0.40
codegen_flags: <defaults>
</compile_context>

<pallas_src>
import functools
import math

import jax
import jax.numpy as jnp
from jax import lax
from jax.experimental import pallas as pl
from jax.experimental.pallas import tpu as pltpu


_VMEM_LIMIT_BYTES = 16 * 1024 * 1024  # modest explicit limit; fits v5e/v6e/v7x


def _round_up(x, m):
    return (x + m - 1) // m * m


# ----------------------------------------------------------------------------
# Pallas kernels
# ----------------------------------------------------------------------------
def _conv_act_kernel(p_ref, w_ref, o_ref, *, slope):
    """One row tile of: out = [leaky_relu](patches @ weight).

    patches / weight are bf16 (MXU-native); accumulation and the epilogue run
    in f32; the result is cast only at the final store (bf16 inter-layer
    storage, f32 only where required).
    """
    acc = jnp.dot(p_ref[...], w_ref[...], preferred_element_type=jnp.float32)
    if slope is not None:
        acc = jnp.where(acc >= 0, acc, slope * acc)  # fused LeakyReLU
    o_ref[...] = acc.astype(o_ref.dtype)


def _conv_bn_lrelu_kernel(p_ref, w_ref, g_ref, b_ref, o_ref, *,
                          n_rows, slope, eps):
    """Fused conv + training-mode BatchNorm + LeakyReLU on ONE resident tile.

    All valid output rows live in this single row tile, so the batch
    statistics are computed in-kernel (sublane reductions) and applied
    immediately -- no stats outputs, no separate affine pass.

    Padded rows / padded output channels are exactly zero after the matmul
    (zero patches rows, zero weight columns), so they contribute nothing to
    the sums; the divisor uses the true row count `n_rows`.
    Variance uses E[x^2] - E[x]^2 (zero-row safe); fine at these magnitudes.
    """
    acc = jnp.dot(p_ref[...], w_ref[...], preferred_element_type=jnp.float32)
    inv_n = 1.0 / n_rows
    mean = jnp.sum(acc, axis=0, keepdims=True) * inv_n          # (1, C)
    var = jnp.sum(acc * acc, axis=0, keepdims=True) * inv_n - mean * mean
    scale = g_ref[...] * lax.rsqrt(var + eps)                   # (1, C)
    shift = b_ref[...] - mean * scale
    y = acc * scale + shift
    y = jnp.where(y >= 0, y, slope * y)                         # LeakyReLU
    o_ref[...] = y.astype(o_ref.dtype)


def _conv_cout1_kernel(p_ref, w_ref, b_ref, o_ref):
    """Cout=1 conv as VPU multiply + lane reduction (+ bias), no MXU padding.

    p_ref: (tr, Kp) bf16, w_ref: (1, Kp) bf16, b_ref: (1, 1) f32.
    """
    prod = p_ref[...].astype(jnp.float32) * w_ref[...].astype(jnp.float32)
    red = jnp.sum(prod, axis=1, keepdims=True)                  # (tr, 1)
    o_ref[...] = red + b_ref[...]


# ----------------------------------------------------------------------------
# Pallas wrappers
# ----------------------------------------------------------------------------
def conv_act(patches, w_pad, *, slope=None, out_dtype=jnp.bfloat16,
             row_tile=256):
    """Row-tiled, pipelined matmul with fused activation.

    `w_pad` is pre-padded/pre-cast (Kp, Cp) bf16.  Returns the PADDED
    (Rp, Cp) output; callers slice back to the true (R, Cout).
    """
    R, K = patches.shape
    kp, cp = w_pad.shape
    tr = row_tile if R >= row_tile else _round_up(max(R, 16), 16)
    rp = _round_up(R, tr)
    p = jnp.pad(patches, ((0, rp - R), (0, kp - K)))

    return pl.pallas_call(
        functools.partial(_conv_act_kernel, slope=slope),
        grid=(rp // tr,),
        in_specs=[pl.BlockSpec((tr, kp), lambda i: (i, 0)),   # row-tiled patches
                  pl.BlockSpec((kp, cp), lambda i: (0, 0))],  # resident weight
        out_specs=pl.BlockSpec((tr, cp), lambda i: (i, 0)),
        out_shape=jax.ShapeDtypeStruct((rp, cp), out_dtype),
        compiler_params=pltpu.CompilerParams(
            dimension_semantics=("parallel",),
            vmem_limit_bytes=_VMEM_LIMIT_BYTES),
    )(p, w_pad)


def conv_bn_lrelu(patches, w_pad, gamma_pad, beta_pad, *, n_rows, slope=0.2,
                  eps=1e-5, out_dtype=jnp.bfloat16):
    """Fully-fused conv + BatchNorm(batch stats) + LeakyReLU (single tile)."""
    R, K = patches.shape
    kp, cp = w_pad.shape
    rp = _round_up(max(R, 16), 16)
    # TODO(synk): two-pass / per-tile-partial stats path for R > one tile.
    assert rp <= 1024, "fused single-tile BN path requires all rows resident"
    p = jnp.pad(patches, ((0, rp - R), (0, kp - K)))

    return pl.pallas_call(
        functools.partial(_conv_bn_lrelu_kernel, n_rows=float(n_rows),
                          slope=slope, eps=eps),
        grid=(1,),
        in_specs=[pl.BlockSpec((rp, kp), lambda i: (0, 0)),
                  pl.BlockSpec((kp, cp), lambda i: (0, 0)),
                  pl.BlockSpec((1, cp), lambda i: (0, 0)),
                  pl.BlockSpec((1, cp), lambda i: (0, 0))],
        out_specs=pl.BlockSpec((rp, cp), lambda i: (0, 0)),
        out_shape=jax.ShapeDtypeStruct((rp, cp), out_dtype),
        compiler_params=pltpu.CompilerParams(
            dimension_semantics=("arbitrary",),
            vmem_limit_bytes=_VMEM_LIMIT_BYTES),
    )(p, w_pad, gamma_pad, beta_pad)


def conv_cout1(patches, w_row_pad, bias, *, row_tile=256):
    """Cout=1 conv with bias as a VPU mul + lane-reduce kernel (no MXU)."""
    R, K = patches.shape
    _, kp = w_row_pad.shape
    tr = row_tile if R >= row_tile else _round_up(max(R, 16), 16)
    rp = _round_up(R, tr)
    p = jnp.pad(patches, ((0, rp - R), (0, kp - K)))

    return pl.pallas_call(
        _conv_cout1_kernel,
        grid=(rp // tr,),
        in_specs=[pl.BlockSpec((tr, kp), lambda i: (i, 0)),
                  pl.BlockSpec((1, kp), lambda i: (0, 0)),
                  pl.BlockSpec((1, 1), lambda i: (0, 0))],
        out_specs=pl.BlockSpec((tr, 1), lambda i: (i, 0)),
        out_shape=jax.ShapeDtypeStruct((rp, 1), jnp.float32),
        compiler_params=pltpu.CompilerParams(
            dimension_semantics=("parallel",),
            vmem_limit_bytes=_VMEM_LIMIT_BYTES),
    )(p, w_row_pad, bias)


# ----------------------------------------------------------------------------
# Plain-JAX glue: channels-last im2col (no full-tensor transposes).
# Patch column ordering is (kh, kw, cin), matching the reshaped weights.
# TODO(synk): replace with in-kernel shifted-tap accumulation (implicit GEMM).
# ----------------------------------------------------------------------------
def im2col_nhwc(x, kh, kw, stride, pad):
    N, H, W, C = x.shape
    xp = jnp.pad(x, ((0, 0), (pad, pad), (pad, pad), (0, 0)))
    OH = (H + 2 * pad - kh) // stride + 1
    OW = (W + 2 * pad - kw) // stride + 1
    taps = [xp[:, i:i + stride * OH:stride, j:j + stride * OW:stride, :]
            for i in range(kh) for j in range(kw)]
    p = jnp.stack(taps, axis=3)                       # (N, OH, OW, kh*kw, C)
    p = p.reshape(N * OH * OW, kh * kw * C)
    return p, OH, OW


# ----------------------------------------------------------------------------
# Parameter init (matches the PyTorch module's shapes and init scheme);
# weights are pre-padded to lane-dense shapes and pre-cast to bf16 here, once.
# ----------------------------------------------------------------------------
def init_params(key, in_channels=3, num_channels=32):
    nc = num_channels
    ks = jax.random.split(key, 6)

    def conv_w(rng, cout, cin):
        # PyTorch layout (Cout, Cin, KH, KW), init N(0, 0.02); convert to
        # (KH*KW*Cin, Cout) to match im2col column ordering, then pad to
        # lane-dense (Kp, Cp) and cast to bf16 (MXU operand dtype).
        w = 0.02 * jax.random.normal(rng, (cout, cin, 4, 4), jnp.float32)
        w = w.transpose(2, 3, 1, 0).reshape(16 * cin, cout)
        kp = _round_up(16 * cin, 128)
        cp = _round_up(cout, 128)
        return jnp.pad(w, ((0, kp - 16 * cin), (0, cp - cout))).astype(
            jnp.bfloat16)

    # Layer 4 (Cout=1) weight is kept as a (1, K) row vector for the VPU
    # mul+reduce kernel (K = 16 * 2nc is already a multiple of 128).
    w4 = 0.02 * jax.random.normal(ks[3], (1, 2 * nc, 4, 4), jnp.float32)
    w4_row = w4.transpose(2, 3, 1, 0).reshape(1, 16 * 2 * nc).astype(
        jnp.bfloat16)

    cp2 = _round_up(2 * nc, 128)
    gamma = 1.0 + 0.02 * jax.random.normal(ks[4], (1, 2 * nc), jnp.float32)

    fan_in = 2 * nc * 4 * 4
    bound = 1.0 / math.sqrt(fan_in)
    return {
        "w1": conv_w(ks[0], nc, in_channels),
        "w2": conv_w(ks[1], 2 * nc, nc),
        "w3": conv_w(ks[2], 2 * nc, 2 * nc),
        "w4": w4_row,
        "bn_gamma": jnp.pad(gamma, ((0, 0), (0, cp2 - 2 * nc))),
        "bn_beta": jnp.zeros((1, cp2), jnp.float32),
        # Last conv has bias=True; PyTorch default init U(-1/sqrt(fan_in), +).
        "b4": jax.random.uniform(ks[5], (1, 1), jnp.float32,
                                 minval=-bound, maxval=bound),
    }


# ----------------------------------------------------------------------------
# Forward pass (semantics of the PyTorch Discriminator.forward)
# ----------------------------------------------------------------------------
@functools.partial(jax.jit, static_argnames=("num_channels",))
def discriminator_forward(x_nchw, params, num_channels=32):
    N = x_nchw.shape[0]
    nc = num_channels

    # Single boundary transpose NCHW -> NHWC; bf16 everywhere between layers.
    x = jnp.transpose(x_nchw, (0, 2, 3, 1)).astype(jnp.bfloat16)

    # Layer 1: Conv(3 -> nc, k4 s2 p1, no bias) + LeakyReLU(0.2)
    p, oh, ow = im2col_nhwc(x, 4, 4, 2, 1)
    R = N * oh * ow
    y = conv_act(p, params["w1"], slope=0.2)
    x = y[:R, :nc].reshape(N, oh, ow, nc)

    # Layer 2: Conv(nc -> 2nc, k4 s2 p1, no bias) + BatchNorm + LeakyReLU(0.2)
    # One fused kernel: matmul -> batch mean/var -> affine -> LeakyReLU.
    p, oh, ow = im2col_nhwc(x, 4, 4, 2, 1)
    R = N * oh * ow
    y = conv_bn_lrelu(p, params["w2"], params["bn_gamma"], params["bn_beta"],
                      n_rows=R, slope=0.2, eps=1e-5)
    x = y[:R, :2 * nc].reshape(N, oh, ow, 2 * nc)

    # Layer 3: Conv(2nc -> 2nc, k4 s1 p1, no bias)  [no BN/activation, per spec]
    p, oh, ow = im2col_nhwc(x, 4, 4, 1, 1)
    R = N * oh * ow
    y = conv_act(p, params["w3"], slope=None)
    x = y[:R, :2 * nc].reshape(N, oh, ow, 2 * nc)

    # Layer 4: Conv(2nc -> 1, k4 s1 p1, bias=True) -- VPU mul+reduce, f32 out.
    p, oh, ow = im2col_nhwc(x, 4, 4, 1, 1)
    R = N * oh * ow
    y = conv_cout1(p, params["w4"], params["b4"])
    out = y[:R, :1].reshape(N, oh, ow, 1)

    # Back to PyTorch's NCHW at the boundary.
    return jnp.transpose(out, (0, 3, 1, 2))


# ----------------------------------------------------------------------------
if __name__ == "__main__":
    key = jax.random.PRNGKey(0)
    k_param, k_input = jax.random.split(key)

    params = init_params(k_param, in_channels=3, num_channels=32)

    # Small input consistent with the module: NCHW, batch=2, 3ch, 16x16.
    x = jax.random.normal(k_input, (2, 3, 16, 16), jnp.float32)

    out = discriminator_forward(x, params)
    out = jax.block_until_ready(out)

    # Spatial: 16 -> 8 -> 4 -> 3 -> 2, channels -> 1.
    assert out.shape == (2, 1, 2, 2), out.shape
    assert out.dtype == jnp.float32
    assert bool(jnp.all(jnp.isfinite(out)))

    print("KERNEL_OK")
</pallas_src>

<mosaic_0001>
module attributes {stable_mosaic.version = 11 : i64} {
  func.func @_conv_act_kernel(%arg0: i32, %arg1: memref<128x128xbf16, #tpu.memory_space<vmem>>, %arg2: memref<128x128xbf16, #tpu.memory_space<vmem>>, %arg3: memref<128x128xbf16, #tpu.memory_space<vmem>>) attributes {dimension_semantics = [#tpu.dimension_semantics<parallel>], iteration_bounds = array<i64: 1>, scalar_prefetch = 0 : i64, scratch_operands = 0 : i64, tpu.core_type = #tpu.core_type<tc>, window_params = [{transform_indices = @transform_0, window_bounds = array<i64: 128, 128>}, {pipeline_mode = #tpu.pipeline_mode<synchronous>, transform_indices = @transform_1, window_bounds = array<i64: 128, 128>}, {transform_indices = @transform_2, window_bounds = array<i64: 128, 128>}]} {
    %c0 = arith.constant 0 : index
    %c0_0 = arith.constant 0 : index
    %0 = vector.load %arg1[%c0, %c0_0] : memref<128x128xbf16, #tpu.memory_space<vmem>>, vector<128x128xbf16>
    %c0_1 = arith.constant 0 : index
    %c0_2 = arith.constant 0 : index
    %1 = vector.load %arg2[%c0_1, %c0_2] : memref<128x128xbf16, #tpu.memory_space<vmem>>, vector<128x128xbf16>
    %cst = arith.constant dense<0.000000e+00> : vector<128x128xf32>
    %2 = tpu.matmul %0, %1, %cst {dimension_numbers = #tpu.dot_dimension_numbers<[1], [0], [0], [1], [0, 0, 1, 1], [], []>} : vector<128x128xbf16>, vector<128x128xbf16>, vector<128x128xf32> -> vector<128x128xf32>
    %cst_3 = arith.constant 0.000000e+00 : f32
    %3 = vector.broadcast %cst_3 : f32 to vector<128x128xf32>
    %4 = arith.cmpf oge, %2, %3 : vector<128x128xf32>
    %cst_4 = arith.constant 2.000000e-01 : f32
    %5 = vector.broadcast %cst_4 : f32 to vector<128x128xf32>
    %6 = arith.mulf %5, %2 : vector<128x128xf32>
    %7 = arith.select %4, %2, %6 : vector<128x128xi1>, vector<128x128xf32>
    %8 = arith.truncf %7 : vector<128x128xf32> to vector<128x128xbf16>
    %c0_5 = arith.constant 0 : index
    %c0_6 = arith.constant 0 : index
    %9 = vector.load %arg3[%c0_5, %c0_6] : memref<128x128xbf16, #tpu.memory_space<vmem>>, vector<128x128xbf16>
    tpu.vector_store %arg3[%c0_5, %c0_6], %8 {strides = array<i32>} : memref<128x128xbf16, #tpu.memory_space<vmem>>, vector<128x128xbf16>,
    return
  }
  func.func @transform_0(%arg0: i32) -> (i32, i32) {
    %c0_i32 = arith.constant 0 : i32
    %c0_i32_0 = arith.constant 0 : i32
    return %arg0, %c0_i32 : i32, i32
  }
  func.func @transform_1(%arg0: i32) -> (i32, i32) {
    %c0_i32 = arith.constant 0 : i32
    %c0_i32_0 = arith.constant 0 : i32
    %c0_i32_1 = arith.constant 0 : i32
    return %c0_i32, %c0_i32_0 : i32, i32
  }
  func.func @transform_2(%arg0: i32) -> (i32, i32) {
    %c0_i32 = arith.constant 0 : i32
    %c0_i32_0 = arith.constant 0 : i32
    return %arg0, %c0_i32 : i32, i32
  }
}

module attributes {stable_mosaic.version = 11 : i64} {
  func.func @_conv_bn_lrelu_kernel(%arg0: i32, %arg1: memref<32x512xbf16, #tpu.memory_space<vmem>>, %arg2: memref<512x128xbf16, #tpu.memory_space<vmem>>, %arg3: memref<1x128xf32, #tpu.memory_space<vmem>>, %arg4: memref<1x128xf32, #tpu.memory_space<vmem>>, %arg5: memref<32x128xbf16, #tpu.memory_space<vmem>>) attributes {dimension_semantics = [#tpu.dimension_semantics<arbitrary>], iteration_bounds = array<i64: 1>, scalar_prefetch = 0 : i64, scratch_operands = 0 : i64, tpu.core_type = #tpu.core_type<tc>, window_params = [{pipeline_mode = #tpu.pipeline_mode<synchronous>, transform_indices = @transform_0, window_bounds = array<i64: 32, 512>}, {pipeline_mode = #tpu.pipeline_mode<synchronous>, transform_indices = @transform_1, window_bounds = array<i64: 512, 128>}, {pipeline_mode = #tpu.pipeline_mode<synchronous>, transform_indices = @transform_2, window_bounds = array<i64: 1, 128>}, {pipeline_mode = #tpu.pipeline_mode<synchronous>, transform_indices = @transform_3, window_bounds = array<i64: 1, 128>}, {pipeline_mode = #tpu.pipeline_mode<synchronous>, transform_indices = @transform_4, window_bounds = array<i64: 32, 128>}]} {
    %c0 = arith.constant 0 : index
    %c0_0 = arith.constant 0 : index
    %0 = vector.load %arg1[%c0, %c0_0] : memref<32x512xbf16, #tpu.memory_space<vmem>>, vector<32x512xbf16>
    %c0_1 = arith.constant 0 : index
    %c0_2 = arith.constant 0 : index
    %1 = vector.load %arg2[%c0_1, %c0_2] : memref<512x128xbf16, #tpu.memory_space<vmem>>, vector<512x128xbf16>
    %cst = arith.constant dense<0.000000e+00> : vector<32x128xf32>
    %2 = tpu.matmul %0, %1, %cst {dimension_numbers = #tpu.dot_dimension_numbers<[1], [0], [0], [1], [0, 0, 1, 1], [], []>} : vector<32x512xbf16>, vector<512x128xbf16>, vector<32x128xf32> -> vector<32x128xf32>
    %cst_3 = arith.constant dense<0.000000e+00> : vector<128xf32>
    %3 = vector.multi_reduction <add>, %2, %cst_3 [0] : vector<32x128xf32> to vector<128xf32>
    %4 = vector.shape_cast %3 : vector<128xf32> to vector<1x128xf32>
    %cst_4 = arith.constant 3.125000e-02 : f32
    %5 = vector.broadcast %cst_4 : f32 to vector<1x128xf32>
    %6 = arith.mulf %4, %5 : vector<1x128xf32>
    %7 = arith.mulf %2, %2 : vector<32x128xf32>
    %cst_5 = arith.constant dense<0.000000e+00> : vector<128xf32>
    %8 = vector.multi_reduction <add>, %7, %cst_5 [0] : vector<32x128xf32> to vector<128xf32>
    %9 = vector.shape_cast %8 : vector<128xf32> to vector<1x128xf32>
    %cst_6 = arith.constant 3.125000e-02 : f32
    %10 = vector.broadcast %cst_6 : f32 to vector<1x128xf32>
    %11 = arith.mulf %9, %10 : vector<1x128xf32>
    %12 = arith.mulf %6, %6 : vector<1x128xf32>
    %13 = arith.subf %11, %12 : vector<1x128xf32>
    %c0_7 = arith.constant 0 : index
    %c0_8 = arith.constant 0 : index
    %14 = vector.load %arg3[%c0_7, %c0_8] : memref<1x128xf32, #tpu.memory_space<vmem>>, vector<1x128xf32>
    %cst_9 = arith.constant 9.99999974E-6 : f32
    %15 = vector.broadcast %cst_9 : f32 to vector<1x128xf32>
    %16 = arith.addf %13, %15 : vector<1x128xf32>
    %17 = math.rsqrt %16 : vector<1x128xf32>
    %18 = arith.mulf %14, %17 : vector<1x128xf32>
    %c0_10 = arith.constant 0 : index
    %c0_11 = arith.constant 0 : index
    %19 = vector.load %arg4[%c0_10, %c0_11] : memref<1x128xf32, #tpu.memory_space<vmem>>, vector<1x128xf32>
    %20 = arith.mulf %6, %18 : vector<1x128xf32>
    %21 = arith.subf %19, %20 : vector<1x128xf32>
    %22 = vector.broadcast %18 : vector<1x128xf32> to vector<32x128xf32>
    %23 = arith.mulf %2, %22 : vector<32x128xf32>
    %24 = vector.broadcast %21 : vector<1x128xf32> to vector<32x128xf32>
    %25 = arith.addf %23, %24 : vector<32x128xf32>
    %cst_12 = arith.constant 0.000000e+00 : f32
    %26 = vector.broadcast %cst_12 : f32 to vector<32x128xf32>
    %27 = arith.cmpf oge, %25, %26 : vector<32x128xf32>
    %cst_13 = arith.constant 2.000000e-01 : f32
    %28 = vector.broadcast %cst_13 : f32 to vector<32x128xf32>
    %29 = arith.mulf %28, %25 : vector<32x128xf32>
    %30 = arith.select %27, %25, %29 : vector<32x128xi1>, vector<32x128xf32>
    %31 = arith.truncf %30 : vector<32x128xf32> to vector<32x128xbf16>
    %c0_14 = arith.constant 0 : index
    %c0_15 = arith.constant 0 : index
    %32 = vector.load %arg5[%c0_14, %c0_15] : memref<32x128xbf16, #tpu.memory_space<vmem>>, vector<32x128xbf16>
    tpu.vector_store %arg5[%c0_14, %c0_15], %31 {strides = array<i32>} : memref<32x128xbf16, #tpu.memory_space<vmem>>, vector<32x128xbf16>,
    return
  }
  func.func @transform_0(%arg0: i32) -> (i32, i32) {
    %c0_i32 = arith.constant 0 : i32
    %c0_i32_0 = arith.constant 0 : i32
    %c0_i32_1 = arith.constant 0 : i32
    return %c0_i32, %c0_i32_0 : i32, i32
  }
  func.func @transform_1(%arg0: i32) -> (i32, i32) {
    %c0_i32 = arith.constant 0 : i32
    %c0_i32_0 = arith.constant 0 : i32
    %c0_i32_1 = arith.constant 0 : i32
    return %c0_i32, %c0_i32_0 : i32, i32
  }
  func.func @transform_2(%arg0: i32) -> (i32, i32) {
    %c0_i32 = arith.constant 0 : i32
    %c0_i32_0 = arith.constant 0 : i32
    %c0_i32_1 = arith.constant 0 : i32
    return %c0_i32, %c0_i32_0 : i32, i32
  }
  func.func @transform_3(%arg0: i32) -> (i32, i32) {
    %c0_i32 = arith.constant 0 : i32
    %c0_i32_0 = arith.constant 0 : i32
    %c0_i32_1 = arith.constant 0 : i32
    return %c0_i32, %c0_i32_0 : i32, i32
  }
  func.func @transform_4(%arg0: i32) -> (i32, i32) {
    %c0_i32 = arith.constant 0 : i32
    %c0_i32_0 = arith.constant 0 : i32
    %c0_i32_1 = arith.constant 0 : i32
    return %c0_i32, %c0_i32_0 : i32, i32
  }
}

module attributes {stable_mosaic.version = 11 : i64} {
  func.func @_conv_act_kernel(%arg0: i32, %arg1: memref<32x1024xbf16, #tpu.memory_space<vmem>>, %arg2: memref<1024x128xbf16, #tpu.memory_space<vmem>>, %arg3: memref<32x128xbf16, #tpu.memory_space<vmem>>) attributes {dimension_semantics = [#tpu.dimension_semantics<parallel>], iteration_bounds = array<i64: 1>, scalar_prefetch = 0 : i64, scratch_operands = 0 : i64, tpu.core_type = #tpu.core_type<tc>, window_params = [{transform_indices = @transform_0, window_bounds = array<i64: 32, 1024>}, {pipeline_mode = #tpu.pipeline_mode<synchronous>, transform_indices = @transform_1, window_bounds = array<i64: 1024, 128>}, {transform_indices = @transform_2, window_bounds = array<i64: 32, 128>}]} {
    %c0 = arith.constant 0 : index
    %c0_0 = arith.constant 0 : index
    %0 = vector.load %arg1[%c0, %c0_0] : memref<32x1024xbf16, #tpu.memory_space<vmem>>, vector<32x1024xbf16>
    %c0_1 = arith.constant 0 : index
    %c0_2 = arith.constant 0 : index
    %1 = vector.load %arg2[%c0_1, %c0_2] : memref<1024x128xbf16, #tpu.memory_space<vmem>>, vector<1024x128xbf16>
    %cst = arith.constant dense<0.000000e+00> : vector<32x128xf32>
    %2 = tpu.matmul %0, %1, %cst {dimension_numbers = #tpu.dot_dimension_numbers<[1], [0], [0], [1], [0, 0, 1, 1], [], []>} : vector<32x1024xbf16>, vector<1024x128xbf16>, vector<32x128xf32> -> vector<32x128xf32>
    %3 = arith.truncf %2 : vector<32x128xf32> to vector<32x128xbf16>
    %c0_3 = arith.constant 0 : index
    %c0_4 = arith.constant 0 : index
    %4 = vector.load %arg3[%c0_3, %c0_4] : memref<32x128xbf16, #tpu.memory_space<vmem>>, vector<32x128xbf16>
    tpu.vector_store %arg3[%c0_3, %c0_4], %3 {strides = array<i32>} : memref<32x128xbf16, #tpu.memory_space<vmem>>, vector<32x128xbf16>,
    return
  }
  func.func @transform_0(%arg0: i32) -> (i32, i32) {
    %c0_i32 = arith.constant 0 : i32
    %c0_i32_0 = arith.constant 0 : i32
    return %arg0, %c0_i32 : i32, i32
  }
  func.func @transform_1(%arg0: i32) -> (i32, i32) {
    %c0_i32 = arith.constant 0 : i32
    %c0_i32_0 = arith.constant 0 : i32
    %c0_i32_1 = arith.constant 0 : i32
    return %c0_i32, %c0_i32_0 : i32, i32
  }
  func.func @transform_2(%arg0: i32) -> (i32, i32) {
    %c0_i32 = arith.constant 0 : i32
    %c0_i32_0 = arith.constant 0 : i32
    return %arg0, %c0_i32 : i32, i32
  }
}

module attributes {stable_mosaic.version = 11 : i64} {
  func.func @_conv_cout1_kernel(%arg0: i32, %arg1: memref<16x1024xbf16, #tpu.memory_space<vmem>>, %arg2: memref<1x1024xbf16, #tpu.memory_space<vmem>>, %arg3: memref<1x1xf32, #tpu.memory_space<vmem>>, %arg4: memref<16x1xf32, #tpu.memory_space<vmem>>) attributes {dimension_semantics = [#tpu.dimension_semantics<parallel>], iteration_bounds = array<i64: 1>, scalar_prefetch = 0 : i64, scratch_operands = 0 : i64, tpu.core_type = #tpu.core_type<tc>, window_params = [{transform_indices = @transform_0, window_bounds = array<i64: 16, 1024>}, {pipeline_mode = #tpu.pipeline_mode<synchronous>, transform_indices = @transform_1, window_bounds = array<i64: 1, 1024>}, {pipeline_mode = #tpu.pipeline_mode<synchronous>, transform_indices = @transform_2, window_bounds = array<i64: 1, 1>}, {transform_indices = @transform_3, window_bounds = array<i64: 16, 1>}]} {
    %c0 = arith.constant 0 : index
    %c0_0 = arith.constant 0 : index
    %0 = vector.load %arg1[%c0, %c0_0] : memref<16x1024xbf16, #tpu.memory_space<vmem>>, vector<16x1024xbf16>
    %1 = arith.extf %0 : vector<16x1024xbf16> to vector<16x1024xf32>
    %c0_1 = arith.constant 0 : index
    %c0_2 = arith.constant 0 : index
    %2 = vector.load %arg2[%c0_1, %c0_2] : memref<1x1024xbf16, #tpu.memory_space<vmem>>, vector<1x1024xbf16>
    %3 = arith.extf %2 : vector<1x1024xbf16> to vector<1x1024xf32>
    %4 = vector.broadcast %3 : vector<1x1024xf32> to vector<16x1024xf32>
    %5 = arith.mulf %1, %4 : vector<16x1024xf32>
    %cst = arith.constant dense<0.000000e+00> : vector<16xf32>
    %6 = vector.multi_reduction <add>, %5, %cst [1] : vector<16x1024xf32> to vector<16xf32>
    %7 = vector.shape_cast %6 : vector<16xf32> to vector<16x1xf32>
    %c0_3 = arith.constant 0 : index
    %c0_4 = arith.constant 0 : index
    %8 = vector.load %arg3[%c0_3, %c0_4] : memref<1x1xf32, #tpu.memory_space<vmem>>, vector<1x1xf32>
    %9 = vector.broadcast %8 : vector<1x1xf32> to vector<16x1xf32>
    %10 = arith.addf %7, %9 : vector<16x1xf32>
    %c0_5 = arith.constant 0 : index
    %c0_6 = arith.constant 0 : index
    %11 = vector.load %arg4[%c0_5, %c0_6] : memref<16x1xf32, #tpu.memory_space<vmem>>, vector<16x1xf32>
    tpu.vector_store %arg4[%c0_5, %c0_6], %10 {strides = array<i32>} : memref<16x1xf32, #tpu.memory_space<vmem>>, vector<16x1xf32>,
    return
  }
  func.func @transform_0(%arg0: i32) -> (i32, i32) {
    %c0_i32 = arith.constant 0 : i32
    %c0_i32_0 = arith.constant 0 : i32
    return %arg0, %c0_i32 : i32, i32
  }
  func.func @transform_1(%arg0: i32) -> (i32, i32) {
    %c0_i32 = arith.constant 0 : i32
    %c0_i32_0 = arith.constant 0 : i32
    %c0_i32_1 = arith.constant 0 : i32
    return %c0_i32, %c0_i32_0 : i32, i32
  }
  func.func @transform_2(%arg0: i32) -> (i32, i32) {
    %c0_i32 = arith.constant 0 : i32
    %c0_i32_0 = arith.constant 0 : i32
    %c0_i32_1 = arith.constant 0 : i32
    return %c0_i32, %c0_i32_0 : i32, i32
  }
  func.func @transform_3(%arg0: i32) -> (i32, i32) {
    %c0_i32 = arith.constant 0 : i32
    %c0_i32_0 = arith.constant 0 : i32
    return %arg0, %c0_i32 : i32, i32
  }
}

</mosaic_0001>

<bundles_post_ra>
// kernel: discriminator_forward.4
= control target key start
LH: loop header
LB: loop body
LE: loop exit
PB: predicated region body
PF: predicated region fallthrough
CT: control target
= control target key end

     0   :  { %s634_s1 = inlined_call_operand.vmem [shape: bf16[128,128], index: 1, kind: input, shape index: {}]   ;;  %s635_s0 = inlined_call_operand.vmem [shape: bf16[128,128], index: 0, kind: input, shape index: {}]   ;;  %s636_s2 = inlined_call_operand.vmem [shape: bf16[128,128], index: 2, kind: output, shape index: {}]  }
   0x1   :  { %v528_v0 = vld [vmem:[%s634_s1 + $0x38] sm:$0xff]   ;;  %v529_v1 = vld [vmem:[%s634_s1 + $0x30] sm:$0xff]   ;;  %v530_v2 = vld [vmem:[%s634_s1 + $0x28] sm:$0xff]  }
   0x2   :  { %480 = vmatprep.subr.bf16.mxu0 %v528_v0  ;;  %512 = vmatprep.subr.bf16.mxu1 %v528_v0  ;;  %v531_v3 = vld [vmem:[%s634_s1 + $0x20] sm:$0xff]   ;;  %v532_v6 = vld [vmem:[%s634_s1 + $0x18] sm:$0xff]   ;;  %v533_v7 = vld [vmem:[%s634_s1 + $0x10] sm:$0xff]  }
   0x3   :  { %481 = vmatpush3.bf16.msra.mxu0 %v528_v0  ;;  %520 = vmatpush3.bf16.msra.mxu1 %v528_v0  ;;  %v536_v4 = vld [vmem:[%s635_s0] sm:$0xff]   ;;  %v534_v8 = vld [vmem:[%s634_s1 + $0x8] sm:$0xff]   ;;  %v540_v12 = vld [vmem:[%s635_s0 + $0x10] sm:$0xff]  }
   0x4   :  { %482 = vmatprep.subr.bf16.mxu0 %v529_v1  ;;  %513 = vmatprep.subr.bf16.mxu1 %v529_v1  ;;  %v537_v5 = vld [vmem:[%s635_s0 + $0x20] sm:$0xff]   ;;  %v538_v10 = vld [vmem:[%s635_s0 + $0x8] sm:$0xff]   ;;  %v541_v13 = vld [vmem:[%s635_s0 + $0x30] sm:$0xff]  }
   0x5   :  { %496 = vmatprep.mubr.bf16.mxu0 %v536_v4  ;;  %504 = vmatprep.mubr.bf16.mxu1 %v537_v5  ;;  %v535_v9 = vld [vmem:[%s634_s1] sm:$0xff]   ;;  %v539_v11 = vld [vmem:[%s635_s0 + $0x28] sm:$0xff]   ;;  %v542_v14 = vld [vmem:[%s635_s0 + $0x18] sm:$0xff]  }
   0x6   :  { %v543_v15 = vld [vmem:[%s635_s0 + $0x38] sm:$0xff]  }
   0x7   :  { %483 = vmatpush3.bf16.msra.mxu0 %v529_v1  ;;  %521 = vmatpush3.bf16.msra.mxu1 %v529_v1 }
   0x8   :  { %484 = vmatprep.subr.bf16.mxu0 %v530_v2  ;;  %514 = vmatprep.subr.bf16.mxu1 %v530_v2 }
   0xb   :  { %485 = vmatpush3.bf16.msra.mxu0 %v530_v2  ;;  %522 = vmatpush3.bf16.msra.mxu1 %v530_v2 }
   0xc   :  { %486 = vmatprep.subr.bf16.mxu0 %v531_v3  ;;  %515 = vmatprep.subr.bf16.mxu1 %v531_v3 }
   0xf   :  { %487 = vmatpush3.bf16.msra.mxu0 %v531_v3  ;;  %523 = vmatpush3.bf16.msra.mxu1 %v531_v3 }
  0x10   :  { %488 = vmatprep.subr.bf16.mxu0 %v532_v6  ;;  %516 = vmatprep.subr.bf16.mxu1 %v532_v6 }
  0x13   :  { %489 = vmatpush3.bf16.msra.mxu0 %v532_v6  ;;  %524 = vmatpush3.bf16.msra.mxu1 %v532_v6 }
  0x14   :  { %490 = vmatprep.subr.bf16.mxu0 %v533_v7  ;;  %517 = vmatprep.subr.bf16.mxu1 %v533_v7 }
  0x17   :  { %491 = vmatpush3.bf16.msra.mxu0 %v533_v7  ;;  %525 = vmatpush3.bf16.msra.mxu1 %v533_v7 }
  0x18   :  { %492 = vmatprep.subr.bf16.mxu0 %v534_v8  ;;  %518 = vmatprep.subr.bf16.mxu1 %v534_v8 }
  0x1b   :  { %493 = vmatpush3.bf16.msra.mxu0 %v534_v8  ;;  %526 = vmatpush3.bf16.msra.mxu1 %v534_v8 }
  0x1c   :  { %494 = vmatprep.subr.bf16.mxu0 %v535_v9  ;;  %519 = vmatprep.subr.bf16.mxu1 %v535_v9 }
  0x1f   :  { %495 = vmatpush3.bf16.msra.mxu0 %v535_v9  ;;  %527 = vmatpush3.bf16.msra.mxu1 %v535_v9 }
  0x22   :  { %497 = vmatmul.mubr.bf16.vlgmr.msra.gmra.mxu0 %v538_v10  ;;  %505 = vmatmul.mubr.bf16.vlgmr.msra.gmra.mxu1 %v539_v11 }
  0x23   :  { %500 = vmatprep.mubr.bf16.mxu0 %v540_v12  ;;  %508 = vmatprep.mubr.bf16.mxu1 %v541_v13 }
  0x2a   :  { %501 = vmatmul.mubr.bf16.gmra.mxu0 %v542_v14  ;;  %509 = vmatmul.mubr.bf16.gmra.mxu1 %v543_v15 }
  0xe2   :  { %v498_v16 = vpop.f32.mrf.mxu0  ;;  %v506_v17 = vpop.f32.mrf.mxu1 }
  0xe3   :  { %vm239_vm0 = vcmp.ge.f32.partialorder %v498_v16, 0.0  ;;  %v255_v18 = vmul.f32 0.2, %v498_v16  ;;  %v263_v19 = vmul.f32 0.2, %v506_v17  ;;  %vm247_vm1 = vcmp.ge.f32.partialorder %v506_v17, 0.0 }
  0xe4   :  { %v174_v20 = vpop.f32.mrf.mxu0  ;;  %v206_v21 = vpop.f32.mrf.mxu1 }
  0xe5   :  { %v271_v22 = vsel %vm239_vm0, %v498_v16, %v255_v18  ;;  %v253_v23 = vmul.f32 0.2, %v174_v20  ;;  %vm237_vm2 = vcmp.ge.f32.partialorder %v174_v20, 0.0  ;;  %v279_v27 = vsel %vm247_vm1, %v506_v17, %v263_v19 }
  0xe6   :  { %v499_v24 = vpop.f32.mrf.mxu0  ;;  %v507_v25 = vpop.f32.mrf.mxu1  ;;  %vm245_vm5 = vcmp.ge.f32.partialorder %v206_v21, 0.0  ;;  %v261_v28 = vmul.f32 0.2, %v206_v21 }
  0xe7   :  { %vm240_vm3 = vcmp.ge.f32.partialorder %v499_v24, 0.0  ;;  %v256_v26 = vmul.f32 0.2, %v499_v24  ;;  %vm248_vm4 = vcmp.ge.f32.partialorder %v507_v25, 0.0  ;;  %v264_v29 = vmul.f32 0.2, %v507_v25 }
  0xe8   :  { %v177_v30 = vpop.f32.mrf.mxu0  ;;  %v209_v31 = vpop.f32.mrf.mxu1  ;;  %v269_v34 = vsel %vm237_vm2, %v174_v20, %v253_v23  ;;  %v277_v43 = vsel %vm245_vm5, %v206_v21, %v261_v28 }
  0xe9   :  { %v272_v32 = vsel %vm240_vm3, %v499_v24, %v256_v26  ;;  %vm238_vm6 = vcmp.ge.f32.partialorder %v177_v30, 0.0  ;;  %v254_v33 = vmul.f32 0.2, %v177_v30  ;;  %vm246_vm7 = vcmp.ge.f32.partialorder %v209_v31, 0.0 }
  0xea   :  { %v425_v35 = vpack.c.bf16 %v272_v32, %v271_v22  ;;  %v280_v36 = vsel %vm248_vm4, %v507_v25, %v264_v29  ;;  %v262_v37 = vmul.f32 0.2, %v209_v31  ;;  %v502_v38 = vpop.f32.mrf.mxu0  ;;  %v510_v39 = vpop.f32.mrf.mxu1 }
  0xeb   :  { %v445_v40 = vpack.c.bf16 %v280_v36, %v279_v27  ;;  %v270_v41 = vsel %vm238_vm6, %v177_v30, %v254_v33  ;;  %vm243_vm8 = vcmp.ge.f32.partialorder %v502_v38, 0.0  ;;  %v259_v42 = vmul.f32 0.2, %v502_v38 }
  0xec   :  { %457 = vst [vmem:[%s636_s2 + $0x8] sm:$0xff] %v425_v35   ;;  %v420_v44 = vpack.c.bf16 %v270_v41, %v269_v34  ;;  %v278_v45 = vsel %vm246_vm7, %v209_v31, %v262_v37  ;;  %v190_v46 = vpop.f32.mrf.mxu0  ;;  %v222_v47 = vpop.f32.mrf.mxu1  ;;  %vm251_vm9 = vcmp.ge.f32.partialorder %v510_v39, 0.0  ;;  %v267_v50 = vmul.f32 0.2, %v510_v39 }
  0xed   :  { %461 = vst [vmem:[%s636_s2 + $0x28] sm:$0xff] %v445_v40   ;;  %v440_v48 = vpack.c.bf16 %v278_v45, %v277_v43  ;;  %v275_v49 = vsel %vm243_vm8, %v502_v38, %v259_v42  ;;  %v257_v53 = vmul.f32 0.2, %v190_v46  ;;  %vm241_vm12 = vcmp.ge.f32.partialorder %v190_v46, 0.0 }
  0xee   :  { %421 = vst [vmem:[%s636_s2] sm:$0xff] %v420_v44   ;;  %v503_v51 = vpop.f32.mrf.mxu0  ;;  %v511_v52 = vpop.f32.mrf.mxu1  ;;  %vm249_vm13 = vcmp.ge.f32.partialorder %v222_v47, 0.0  ;;  %v265_v55 = vmul.f32 0.2, %v222_v47  ;;  %v283_v61 = vsel %vm251_vm9, %v510_v39, %v267_v50 }
  0xef   :  { %460 = vst [vmem:[%s636_s2 + $0x20] sm:$0xff] %v440_v48   ;;  %vm244_vm10 = vcmp.ge.f32.partialorder %v503_v51, 0.0  ;;  %v260_v54 = vmul.f32 0.2, %v503_v51  ;;  %vm252_vm11 = vcmp.ge.f32.partialorder %v511_v52, 0.0  ;;  %v273_v1 = vsel %vm241_vm12, %v190_v46, %v257_v53 }
  0xf0   :  { %v268_v56 = vmul.f32 0.2, %v511_v52  ;;  %v193_v57 = vpop.f32.mrf.mxu0  ;;  %v225_v58 = vpop.f32.mrf.mxu1  ;;  %v281_v4 = vsel %vm249_vm13, %v222_v47, %v265_v55 }
  0xf1   :  { %v276_v59 = vsel %vm244_vm10, %v503_v51, %v260_v54  ;;  %vm242_vm14 = vcmp.ge.f32.partialorder %v193_v57, 0.0  ;;  %v258_v60 = vmul.f32 0.2, %v193_v57  ;;  %vm250_vm15 = vcmp.ge.f32.partialorder %v225_v58, 0.0 }
  0xf2   :  { %v435_v62 = vpack.c.bf16 %v276_v59, %v275_v49  ;;  %v284_v63 = vsel %vm252_vm11, %v511_v52, %v268_v56  ;;  %v266_v0 = vmul.f32 0.2, %v225_v58 }
  0xf3   :  { %v455_v2 = vpack.c.bf16 %v284_v63, %v283_v61  ;;  %v274_v3 = vsel %vm242_vm14, %v193_v57, %v258_v60 }
  0xf4   :  { %459 = vst [vmem:[%s636_s2 + $0x18] sm:$0xff] %v435_v62   ;;  %v430_v5 = vpack.c.bf16 %v274_v3, %v273_v1  ;;  %v282_v6 = vsel %vm250_vm15, %v225_v58, %v266_v0 }
  0xf5   :  { %463 = vst [vmem:[%s636_s2 + $0x38] sm:$0xff] %v455_v2   ;;  %v450_v7 = vpack.c.bf16 %v282_v6, %v281_v4 }
  0xf6   :  { %458 = vst [vmem:[%s636_s2 + $0x10] sm:$0xff] %v430_v5  }
  0xf7   :  { %462 = vst [vmem:[%s636_s2 + $0x30] sm:$0xff] %v450_v7  }

// kernel: discriminator_forward.5
= control target key start
LH: loop header
LB: loop body
LE: loop exit
PB: predicated region body
PF: predicated region fallthrough
CT: control target
= control target key end

     0   :  { %s827_s1 = inlined_call_operand.vmem [shape: bf16[512,128], index: 1, kind: input, shape index: {}]   ;;  %s828_s0 = inlined_call_operand.vmem [shape: bf16[32,512], index: 0, kind: input, shape index: {}]   ;;  %s829_s2 = inlined_call_operand.vmem [shape: f32[1,128], index: 2, kind: input, shape index: {}]   ;;  %s830_s3 = inlined_call_operand.vmem [shape: f32[1,128], index: 3, kind: input, shape index: {}]   ;;  %s831_s4 = inlined_call_operand.vmem [shape: bf16[32,128], index: 4, kind: output, shape index: {}]  }
   0x1   :  { %v624_v0 = vld [vmem:[%s827_s1 + $0x78] sm:$0xff]   ;;  %v628_v4 = vld [vmem:[%s827_s1 + $0x70] sm:$0xff]   ;;  %v632_v8 = vld [vmem:[%s827_s1 + $0x68] sm:$0xff]  }
   0x2   :  { %v625_v1 = vld [vmem:[%s827_s1 + $0xf8] sm:$0xff]   ;;  %568 = vmatprep.subr.bf16.mxu0 %v624_v0  ;;  %v629_v5 = vld [vmem:[%s827_s1 + $0xf0] sm:$0xff]   ;;  %v633_v9 = vld [vmem:[%s827_s1 + $0xe8] sm:$0xff]  }
   0x3   :  { %v626_v2 = vld [vmem:[%s827_s1 + $0x38] sm:$0xff]   ;;  %596 = vmatprep.subr.bf16.mxu1 %v625_v1  ;;  %v630_v6 = vld [vmem:[%s827_s1 + $0x30] sm:$0xff]   ;;  %v634_v10 = vld [vmem:[%s827_s1 + $0x28] sm:$0xff]  }
   0x4   :  { %v627_v3 = vld [vmem:[%s827_s1 + $0xb8] sm:$0xff]   ;;  %569 = vmatpush3.bf16.msra.mxu0 %v626_v2  ;;  %v631_v7 = vld [vmem:[%s827_s1 + $0xb0] sm:$0xff]   ;;  %v635_v11 = vld [vmem:[%s827_s1 + $0xa8] sm:$0xff]  }
   0x5   :  { %597 = vmatpush3.bf16.msra.mxu1 %v627_v3  ;;  %570 = vmatprep.subr.bf16.mxu0 %v628_v4  ;;  %v636_v12 = vld [vmem:[%s827_s1 + $0x60] sm:$0xff]   ;;  %v640_v16 = vld [vmem:[%s827_s1 + $0x58] sm:$0xff]   ;;  %v644_v20 = vld [vmem:[%s827_s1 + $0x50] sm:$0xff]  }
   0x6   :  { %598 = vmatprep.subr.bf16.mxu1 %v629_v5  ;;  %v637_v13 = vld [vmem:[%s827_s1 + $0xe0] sm:$0xff]   ;;  %v641_v17 = vld [vmem:[%s827_s1 + $0xd8] sm:$0xff]   ;;  %v645_v21 = vld [vmem:[%s827_s1 + $0xd0] sm:$0xff]  }
   0x7   :  { %v638_v14 = vld [vmem:[%s827_s1 + $0x20] sm:$0xff]   ;;  %v642_v18 = vld [vmem:[%s827_s1 + $0x18] sm:$0xff]   ;;  %v646_v22 = vld [vmem:[%s827_s1 + $0x10] sm:$0xff]  }
   0x8   :  { %571 = vmatpush3.bf16.msra.mxu0 %v630_v6  ;;  %v639_v15 = vld [vmem:[%s827_s1 + $0xa0] sm:$0xff]   ;;  %v643_v19 = vld [vmem:[%s827_s1 + $0x98] sm:$0xff]   ;;  %v647_v23 = vld [vmem:[%s827_s1 + $0x90] sm:$0xff]  }
   0x9   :  { %599 = vmatpush3.bf16.msra.mxu1 %v631_v7  ;;  %572 = vmatprep.subr.bf16.mxu0 %v632_v8  ;;  %v648_v24 = vld [vmem:[%s827_s1 + $0x48] sm:$0xff]   ;;  %v652_v28 = vld [vmem:[%s827_s1 + $0x40] sm:$0xff]  }
   0xa   :  { %600 = vmatprep.subr.bf16.mxu1 %v633_v9  ;;  %v649_v25 = vld [vmem:[%s827_s1 + $0xc8] sm:$0xff]   ;;  %v653_v29 = vld [vmem:[%s827_s1 + $0xc0] sm:$0xff]  }
   0xb   :  { %v650_v26 = vld [vmem:[%s827_s1 + $0x8] sm:$0xff]   ;;  %v654_v30 = vld [vmem:[%s827_s1] sm:$0xff]  }
   0xc   :  { %573 = vmatpush3.bf16.msra.mxu0 %v634_v10  ;;  %v651_v27 = vld [vmem:[%s827_s1 + $0x88] sm:$0xff]   ;;  %v655_v31 = vld [vmem:[%s827_s1 + $0x80] sm:$0xff]  }
   0xd   :  { %601 = vmatpush3.bf16.msra.mxu1 %v635_v11  ;;  %574 = vmatprep.subr.bf16.mxu0 %v636_v12  ;;  %v656_v32 = vld [vmem:[%s828_s0] ss:$16 sps:$4 sm:$0xff]   ;;  %v658_v33 = vld [vmem:[%s828_s0 + $0x4] ss:$16 sps:$4 sm:$0xff]   ;;  %v659_v34 = vld [vmem:[%s828_s0 + $0x8] ss:$16 sps:$4 sm:$0xff]  }
   0xe   :  { %602 = vmatprep.subr.bf16.mxu1 %v637_v13  ;;  %v661_v35 = vld [vmem:[%s828_s0 + $0xc] ss:$16 sps:$4 sm:$0xff]   ;;  %354 = vmatprep.mubr.bf16.mxu0 %v658_v33  ;;  %v662_v36 = vld [vmem:[%s828_s0 + $0x24] ss:$16 sps:$4 sm:$0xff]   ;;  %v666_v38 = vld [vmem:[%s828_s0 + $0x20] ss:$16 sps:$4 sm:$0xff]  }
   0xf   :  { %403 = vmatprep.mubr.bf16.mxu1 %v661_v35  ;;  %v664_v37 = vld [vmem:[%s828_s0 + $0x2c] ss:$16 sps:$4 sm:$0xff]   ;;  %v667_v39 = vld [vmem:[%s828_s0 + $0x28] ss:$16 sps:$4 sm:$0xff]   ;;  %v446_v33 = vld [vmem:[%s829_s2] sm:$0x1] }
  0x10   :  { %575 = vmatpush3.bf16.msra.mxu0 %v638_v14 }
  0x11   :  { %603 = vmatpush3.bf16.msra.mxu1 %v639_v15  ;;  %576 = vmatprep.subr.bf16.mxu0 %v640_v16 }
  0x12   :  { %604 = vmatprep.subr.bf16.mxu1 %v641_v17 }
  0x14   :  { %577 = vmatpush3.bf16.msra.mxu0 %v642_v18 }
  0x15   :  { %605 = vmatpush3.bf16.msra.mxu1 %v643_v19  ;;  %578 = vmatprep.subr.bf16.mxu0 %v644_v20 }
  0x16   :  { %606 = vmatprep.subr.bf16.mxu1 %v645_v21 }
  0x18   :  { %579 = vmatpush3.bf16.msra.mxu0 %v646_v22 }
  0x19   :  { %607 = vmatpush3.bf16.msra.mxu1 %v647_v23  ;;  %580 = vmatprep.subr.bf16.mxu0 %v648_v24 }
  0x1a   :  { %608 = vmatprep.subr.bf16.mxu1 %v649_v25 }
  0x1c   :  { %581 = vmatpush3.bf16.msra.mxu0 %v650_v26 }
  0x1d   :  { %609 = vmatpush3.bf16.msra.mxu1 %v651_v27  ;;  %582 = vmatprep.subr.bf16.mxu0 %v652_v28 }
  0x1e   :  { %610 = vmatprep.subr.bf16.mxu1 %v653_v29 }
  0x20   :  { %583 = vmatpush3.bf16.msra.mxu0 %v654_v30 }
  0x21   :  { %611 = vmatpush3.bf16.msra.mxu1 %v655_v31  ;;  %v454_v31 = vlaneseq }
  0x23   :  { %355 = vmatmul.mubr.bf16.vlgmr.msra.gmra.mxu0 %v656_v32  ;;  %v455_v32 = vshrl.u32 %v454_v31, 7 }
  0x24   :  { %404 = vmatmul.mubr.bf16.vlgmr.msra.gmra.mxu1 %v659_v34  ;;  %362 = vmatprep.mubr.bf16.mxu0 %v662_v36 }
  0x25   :  { %411 = vmatprep.mubr.bf16.mxu1 %v664_v37  ;;  %v456_v34 = vsub.s32 0, %v455_v32  ;;  %v450_v37 = vld [vmem:[%s830_s3] sm:$0x1] }
  0x2b   :  { %363 = vmatmul.mubr.bf16.gmra.mxu0 %v666_v38 }
  0x2c   :  { %412 = vmatmul.mubr.bf16.gmra.mxu1 %v667_v39 }
  0xe3   :  { %v584_v40 = vpop.f32.mrf.mxu0 }
  0xe4   :  { %v612_v41 = vpop.f32.mrf.mxu1 }
  0xe5   :  { %v585_v42 = vpop.f32.mrf.mxu0 }
  0xe6   :  { %v613_v43 = vpop.f32.mrf.mxu1  ;;  %v586_v49 = vadd.f32 %v585_v42, %v584_v40 }
  0xe7   :  { %v587_v44 = vpop.f32.mrf.mxu0  ;;  %v614_v50 = vadd.f32 %v613_v43, %v612_v41 }
  0xe8   :  { %v615_v45 = vpop.f32.mrf.mxu1 }
  0xe9   :  { %v588_v46 = vpop.f32.mrf.mxu0  ;;  %v406_v58 = vadd.f32 %v614_v50, %v586_v49 }
  0xea   :  { %v589_v47 = vadd.f32 %v588_v46, %v587_v44  ;;  %v616_v48 = vpop.f32.mrf.mxu1 }
  0xeb   :  { %v617_v51 = vadd.f32 %v616_v48, %v615_v45  ;;  %v590_v52 = vpop.f32.mrf.mxu0  ;;  %v430_v3 = vmul.f32 %v406_v58, %v406_v58 }
  0xec   :  { %v618_v53 = vpop.f32.mrf.mxu1 }
  0xed   :  { %v409_v54 = vadd.f32 %v617_v51, %v589_v47  ;;  %v591_v55 = vpop.f32.mrf.mxu0 }
  0xee   :  { %v592_v56 = vadd.f32 %v591_v55, %v590_v52  ;;  %v619_v57 = vpop.f32.mrf.mxu1 }
  0xef   :  { %v620_v59 = vadd.f32 %v619_v57, %v618_v53  ;;  %v593_v60 = vpop.f32.mrf.mxu0  ;;  %v431_v62 = vmul.f32 %v409_v54, %v409_v54  ;;  %v420_v4 = vadd.f32 %v409_v54, %v406_v58 }
  0xf0   :  { %v621_v61 = vpop.f32.mrf.mxu1 }
  0xf1   :  { %v414_v63 = vadd.f32 %v620_v59, %v592_v56  ;;  %v594_v0 = vpop.f32.mrf.mxu0  ;;  %v434_v7 = vadd.f32 %v431_v62, %v430_v3 }
  0xf2   :  { %v595_v1 = vadd.f32 %v594_v0, %v593_v60  ;;  %v622_v2 = vpop.f32.mrf.mxu1 }
  0xf3   :  { %v432_v5 = vmul.f32 %v414_v63, %v414_v63  ;;  %v623_v6 = vadd.f32 %v622_v2, %v621_v61  ;;  %v421_v8 = vadd.f32 %v420_v4, %v414_v63 }
  0xf5   :  { %v417_v9 = vadd.f32 %v623_v6, %v595_v1  ;;  %v435_v10 = vadd.f32 %v434_v7, %v432_v5 }
  0xf7   :  { %v422_v11 = vadd.f32 %v421_v8, %v417_v9  ;;  %v433_v12 = vmul.f32 %v417_v9, %v417_v9 }
  0xf9   :  { %v423_v13 = vrot.slane %v422_v11, 4  ;;  %v436_v14 = vadd.f32 %v435_v10, %v433_v12 }
  0xfb   :  { %v424_v15 = vadd.f32 %v423_v13, %v422_v11  ;;  %v437_v16 = vrot.slane %v436_v14, 4 }
  0xfd   :  { %v425_v17 = vrot.slane %v424_v15, 2  ;;  %v438_v18 = vadd.f32 %v437_v16, %v436_v14 }
  0xff   :  { %v426_v19 = vadd.f32 %v425_v17, %v424_v15  ;;  %v439_v20 = vrot.slane %v438_v18, 2 }
 0x101   :  { %v427_v21 = vrot.slane %v426_v19, 1  ;;  %v440_v22 = vadd.f32 %v439_v20, %v438_v18 }
 0x103   :  { %v428_v23 = vadd.f32 %v427_v21, %v426_v19  ;;  %v441_v24 = vrot.slane %v440_v22, 1 }
 0x105   :  { %v429_v25 = vmul.f32 0.03125, %v428_v23  ;;  %v442_v26 = vadd.f32 %v441_v24, %v440_v22 }
 0x107   :  { %v443_v27 = vmul.f32 0.03125, %v442_v26  ;;  %v444_v28 = vmul.f32 %v429_v25, %v429_v25 }
 0x109   :  { %v445_v29 = vsub.f32 %v443_v27, %v444_v28 }
 0x10b   :  { %v447_v30 = vadd.f32 1e-05, %v445_v29 }
 0x10d   :  { %668 = vrsqrt.f32 %v447_v30 }
 0x11a   :  { %v669_v35 = vpop.eup %668 }
 0x11b   :  { %v449_v36 = vmul.f32 %v669_v35, %v446_v33 }
 0x11d   :  { %v451_v38 = vmul.f32 %v449_v36, %v429_v25  ;;  %v457_v39 = vrot.slane %v449_v36, %v456_v34 }
 0x11f   :  { %v452_v40 = vsub.f32 %v450_v37, %v451_v38  ;;  %v459_v41 = vmul.f32 %v457_v39, %v406_v58  ;;  %v460_v42 = vmul.f32 %v457_v39, %v409_v54  ;;  %v461_v43 = vmul.f32 %v457_v39, %v414_v63 }
 0x120   :  { %v462_v44 = vmul.f32 %v457_v39, %v417_v9 }
 0x121   :  { %v467_v45 = vrot.slane %v452_v40, %v456_v34 }
 0x123   :  { %v469_v46 = vadd.f32 %v467_v45, %v459_v41  ;;  %v470_v47 = vadd.f32 %v467_v45, %v460_v42  ;;  %v471_v48 = vadd.f32 %v467_v45, %v461_v43  ;;  %v472_v49 = vadd.f32 %v467_v45, %v462_v44 }
 0x125   :  { %vm473_vm0 = vcmp.ge.f32.partialorder %v469_v46, 0.0  ;;  %vm474_vm1 = vcmp.ge.f32.partialorder %v470_v47, 0.0  ;;  %vm475_vm2 = vcmp.ge.f32.partialorder %v471_v48, 0.0  ;;  %vm476_vm3 = vcmp.ge.f32.partialorder %v472_v49, 0.0 }
 0x126   :  { %v477_v50 = vmul.f32 0.2, %v469_v46  ;;  %v478_v51 = vmul.f32 0.2, %v470_v47  ;;  %v479_v52 = vmul.f32 0.2, %v471_v48 }
 0x127   :  { %v480_v53 = vmul.f32 0.2, %v472_v49 }
 0x128   :  { %v481_v55 = vsel %vm473_vm0, %v469_v46, %v477_v50  ;;  %v482_v56 = vsel %vm474_vm1, %v470_v47, %v478_v51  ;;  %v483_v57 = vsel %vm475_vm2, %v471_v48, %v479_v52 }
 0x129   :  { %v484_v58 = vsel %vm476_vm3, %v472_v49, %v480_v53  ;;  %v560_v54 = vpack.c.bf16 %v482_v56, %v481_v55 }
 0x12a   :  { %v565_v59 = vpack.c.bf16 %v484_v58, %v483_v57 }
 0x12b   :  { %561 = vst [vmem:[%s831_s4] sm:$0xff] %v560_v54  }
 0x12c   :  { %567 = vst [vmem:[%s831_s4 + $0x8] sm:$0xff] %v565_v59  }

// kernel: discriminator_forward.6
= control target key start
LH: loop header
LB: loop body
LE: loop exit
PB: predicated region body
PF: predicated region fallthrough
CT: control target
= control target key end

     0   :  { %s1376_s1 = inlined_call_operand.vmem [shape: bf16[1024,128], index: 1, kind: input, shape index: {}]   ;;  %s1377_s0 = inlined_call_operand.vmem [shape: bf16[32,1024], index: 0, kind: input, shape index: {}]   ;;  %s1378_s2 = inlined_call_operand.vmem [shape: bf16[32,128], index: 2, kind: output, shape index: {}]  }
   0x1   :  { %v1051_v0 = vld [vmem:[%s1376_s1 + $0x78] sm:$0xff]   ;;  %v1055_v4 = vld [vmem:[%s1376_s1 + $0x70] sm:$0xff]   ;;  %v1059_v8 = vld [vmem:[%s1376_s1 + $0x68] sm:$0xff]  }
   0x2   :  { %v1052_v1 = vld [vmem:[%s1376_s1 + $0xf8] sm:$0xff]   ;;  %939 = vmatprep.subr.bf16.mxu0 %v1051_v0  ;;  %v1056_v5 = vld [vmem:[%s1376_s1 + $0xf0] sm:$0xff]   ;;  %v1060_v9 = vld [vmem:[%s1376_s1 + $0xe8] sm:$0xff]  }
   0x3   :  { %v1053_v2 = vld [vmem:[%s1376_s1 + $0x38] sm:$0xff]   ;;  %967 = vmatprep.subr.bf16.mxu1 %v1052_v1  ;;  %v1057_v6 = vld [vmem:[%s1376_s1 + $0x30] sm:$0xff]   ;;  %v1061_v10 = vld [vmem:[%s1376_s1 + $0x28] sm:$0xff]  }
   0x4   :  { %v1054_v3 = vld [vmem:[%s1376_s1 + $0xb8] sm:$0xff]   ;;  %940 = vmatpush3.bf16.msra.mxu0 %v1053_v2  ;;  %v1058_v7 = vld [vmem:[%s1376_s1 + $0xb0] sm:$0xff]   ;;  %v1062_v11 = vld [vmem:[%s1376_s1 + $0xa8] sm:$0xff]  }
   0x5   :  { %968 = vmatpush3.bf16.msra.mxu1 %v1054_v3  ;;  %941 = vmatprep.subr.bf16.mxu0 %v1055_v4  ;;  %v1063_v12 = vld [vmem:[%s1376_s1 + $0x60] sm:$0xff]   ;;  %v1067_v16 = vld [vmem:[%s1376_s1 + $0x58] sm:$0xff]   ;;  %v1071_v20 = vld [vmem:[%s1376_s1 + $0x50] sm:$0xff]  }
   0x6   :  { %969 = vmatprep.subr.bf16.mxu1 %v1056_v5  ;;  %v1064_v13 = vld [vmem:[%s1376_s1 + $0xe0] sm:$0xff]   ;;  %v1068_v17 = vld [vmem:[%s1376_s1 + $0xd8] sm:$0xff]   ;;  %v1072_v21 = vld [vmem:[%s1376_s1 + $0xd0] sm:$0xff]  }
   0x7   :  { %v1065_v14 = vld [vmem:[%s1376_s1 + $0x20] sm:$0xff]   ;;  %v1069_v18 = vld [vmem:[%s1376_s1 + $0x18] sm:$0xff]   ;;  %v1073_v22 = vld [vmem:[%s1376_s1 + $0x10] sm:$0xff]  }
   0x8   :  { %942 = vmatpush3.bf16.msra.mxu0 %v1057_v6  ;;  %v1066_v15 = vld [vmem:[%s1376_s1 + $0xa0] sm:$0xff]   ;;  %v1070_v19 = vld [vmem:[%s1376_s1 + $0x98] sm:$0xff]   ;;  %v1074_v23 = vld [vmem:[%s1376_s1 + $0x90] sm:$0xff]  }
   0x9   :  { %970 = vmatpush3.bf16.msra.mxu1 %v1058_v7  ;;  %943 = vmatprep.subr.bf16.mxu0 %v1059_v8  ;;  %v1075_v24 = vld [vmem:[%s1376_s1 + $0x48] sm:$0xff]   ;;  %v1079_v28 = vld [vmem:[%s1376_s1 + $0x40] sm:$0xff]   ;;  %v1083_v40 = vld [vmem:[%s1376_s1 + $0x178] sm:$0xff]  }
   0xa   :  { %971 = vmatprep.subr.bf16.mxu1 %v1060_v9  ;;  %v1076_v25 = vld [vmem:[%s1376_s1 + $0xc8] sm:$0xff]   ;;  %v1080_v29 = vld [vmem:[%s1376_s1 + $0xc0] sm:$0xff]   ;;  %v1084_v41 = vld [vmem:[%s1376_s1 + $0x1f8] sm:$0xff]  }
   0xb   :  { %v1077_v26 = vld [vmem:[%s1376_s1 + $0x8] sm:$0xff]   ;;  %v1081_v30 = vld [vmem:[%s1376_s1] sm:$0xff]   ;;  %v1085_v42 = vld [vmem:[%s1376_s1 + $0x138] sm:$0xff]  }
   0xc   :  { %944 = vmatpush3.bf16.msra.mxu0 %v1061_v10  ;;  %v1078_v27 = vld [vmem:[%s1376_s1 + $0x88] sm:$0xff]   ;;  %v1082_v31 = vld [vmem:[%s1376_s1 + $0x80] sm:$0xff]   ;;  %v1086_v43 = vld [vmem:[%s1376_s1 + $0x1b8] sm:$0xff]  }
   0xd   :  { %972 = vmatpush3.bf16.msra.mxu1 %v1062_v11  ;;  %945 = vmatprep.subr.bf16.mxu0 %v1063_v12  ;;  %v12_v32 = vld [vmem:[%s1377_s0] sm:$0xff]  ;;  %v13_v34 = vld [vmem:[%s1377_s0 + $0x8] sm:$0xff]  ;;  %v1087_v44 = vld [vmem:[%s1376_s1 + $0x170] sm:$0xff]  }
   0xe   :  { %973 = vmatprep.subr.bf16.mxu1 %v1064_v13  ;;  %v16_v33 = vld [vmem:[%s1377_s0 + $0x20] sm:$0xff]  ;;  %v17_v37 = vld [vmem:[%s1377_s0 + $0x28] sm:$0xff]  ;;  %v1088_v45 = vld [vmem:[%s1376_s1 + $0x1f0] sm:$0xff]  }
   0xf   :  { %v840_v35 = vcombine.low %v12_v32, %v16_v33  ;;  %v841_v36 = vcombine.high %v12_v32, %v16_v33  ;;  %v842_v38 = vcombine.low %v13_v34, %v17_v37  ;;  %v843_v39 = vcombine.high %v13_v34, %v17_v37  ;;  %v1089_v46 = vld [vmem:[%s1376_s1 + $0x130] sm:$0xff]   ;;  %v1091_v48 = vld [vmem:[%s1376_s1 + $0x168] sm:$0xff]   ;;  %v1095_v52 = vld [vmem:[%s1376_s1 + $0x160] sm:$0xff]  }
  0x10   :  { %946 = vmatpush3.bf16.msra.mxu0 %v1065_v14  ;;  %v1090_v47 = vld [vmem:[%s1376_s1 + $0x1b0] sm:$0xff]   ;;  %v1092_v49 = vld [vmem:[%s1376_s1 + $0x1e8] sm:$0xff]   ;;  %v1096_v53 = vld [vmem:[%s1376_s1 + $0x1e0] sm:$0xff]  }
  0x11   :  { %974 = vmatpush3.bf16.msra.mxu1 %v1066_v15  ;;  %947 = vmatprep.subr.bf16.mxu0 %v1067_v16  ;;  %v1093_v50 = vld [vmem:[%s1376_s1 + $0x128] sm:$0xff]   ;;  %v1097_v54 = vld [vmem:[%s1376_s1 + $0x120] sm:$0xff]   ;;  %v1099_v56 = vld [vmem:[%s1376_s1 + $0x158] sm:$0xff]  }
  0x12   :  { %975 = vmatprep.subr.bf16.mxu1 %v1068_v17  ;;  %652 = vmatprep.mubr.bf16.mxu0 %v841_v36  ;;  %v1094_v51 = vld [vmem:[%s1376_s1 + $0x1a8] sm:$0xff]   ;;  %v1098_v55 = vld [vmem:[%s1376_s1 + $0x1a0] sm:$0xff]   ;;  %v1100_v57 = vld [vmem:[%s1376_s1 + $0x1d8] sm:$0xff]  }
  0x13   :  { %701 = vmatprep.mubr.bf16.mxu1 %v843_v39  ;;  %v20_v58 = vld [vmem:[%s1377_s0 + $0x40] sm:$0xff]  ;;  %v21_v61 = vld [vmem:[%s1377_s0 + $0x48] sm:$0xff]  ;;  %v1101_v1 = vld [vmem:[%s1376_s1 + $0x118] sm:$0xff]  }
  0x14   :  { %948 = vmatpush3.bf16.msra.mxu0 %v1069_v18  ;;  %v24_v59 = vld [vmem:[%s1377_s0 + $0x60] sm:$0xff]  ;;  %v25_v62 = vld [vmem:[%s1377_s0 + $0x68] sm:$0xff]  ;;  %v1102_v3 = vld [vmem:[%s1376_s1 + $0x198] sm:$0xff]  }
  0x15   :  { %976 = vmatpush3.bf16.msra.mxu1 %v1070_v19  ;;  %949 = vmatprep.subr.bf16.mxu0 %v1071_v20  ;;  %v849_v60 = vcombine.high %v20_v58, %v24_v59  ;;  %v848_v63 = vcombine.low %v20_v58, %v24_v59  ;;  %v851_v0 = vcombine.high %v21_v61, %v25_v62  ;;  %v1103_v4 = vld [vmem:[%s1376_s1 + $0x150] sm:$0xff]   ;;  %v1107_v8 = vld [vmem:[%s1376_s1 + $0x148] sm:$0xff]   ;;  %v1111_v12 = vld [vmem:[%s1376_s1 + $0x140] sm:$0xff]  }
  0x16   :  { %977 = vmatprep.subr.bf16.mxu1 %v1072_v21  ;;  %v850_v2 = vcombine.low %v21_v61, %v25_v62  ;;  %v1104_v5 = vld [vmem:[%s1376_s1 + $0x1d0] sm:$0xff]   ;;  %v1108_v9 = vld [vmem:[%s1376_s1 + $0x1c8] sm:$0xff]   ;;  %v1112_v13 = vld [vmem:[%s1376_s1 + $0x1c0] sm:$0xff]  }
  0x17   :  { %v1105_v6 = vld [vmem:[%s1376_s1 + $0x110] sm:$0xff]   ;;  %v1109_v10 = vld [vmem:[%s1376_s1 + $0x108] sm:$0xff]   ;;  %v1113_v14 = vld [vmem:[%s1376_s1 + $0x100] sm:$0xff]  }
  0x18   :  { %950 = vmatpush3.bf16.msra.mxu0 %v1073_v22  ;;  %v1106_v7 = vld [vmem:[%s1376_s1 + $0x190] sm:$0xff]   ;;  %v1110_v11 = vld [vmem:[%s1376_s1 + $0x188] sm:$0xff]   ;;  %v1114_v15 = vld [vmem:[%s1376_s1 + $0x180] sm:$0xff]  }
  0x19   :  { %978 = vmatpush3.bf16.msra.mxu1 %v1074_v23  ;;  %951 = vmatprep.subr.bf16.mxu0 %v1075_v24  ;;  %v14_v16 = vld [vmem:[%s1377_s0 + $0x10] sm:$0xff]  ;;  %v15_v18 = vld [vmem:[%s1377_s0 + $0x18] sm:$0xff] }
  0x1a   :  { %979 = vmatprep.subr.bf16.mxu1 %v1076_v25  ;;  %v18_v17 = vld [vmem:[%s1377_s0 + $0x30] sm:$0xff]  ;;  %v19_v19 = vld [vmem:[%s1377_s0 + $0x38] sm:$0xff] }
  0x1b   :  { %v844_v20 = vcombine.low %v14_v16, %v18_v17  ;;  %v845_v21 = vcombine.high %v14_v16, %v18_v17  ;;  %v846_v22 = vcombine.low %v15_v18, %v19_v19  ;;  %v847_v23 = vcombine.high %v15_v18, %v19_v19  ;;  %v22_v24 = vld [vmem:[%s1377_s0 + $0x50] sm:$0xff] }
  0x1c   :  { %952 = vmatpush3.bf16.msra.mxu0 %v1077_v26  ;;  %v26_v25 = vld [vmem:[%s1377_s0 + $0x70] sm:$0xff]  ;;  %v23_v26 = vld [vmem:[%s1377_s0 + $0x58] sm:$0xff] }
  0x1d   :  { %980 = vmatpush3.bf16.msra.mxu1 %v1078_v27  ;;  %953 = vmatprep.subr.bf16.mxu0 %v1079_v28  ;;  %v853_v27 = vcombine.high %v22_v24, %v26_v25  ;;  %v27_v28 = vld [vmem:[%s1377_s0 + $0x78] sm:$0xff] }
  0x1e   :  { %981 = vmatprep.subr.bf16.mxu1 %v1080_v29  ;;  %v855_v29 = vcombine.high %v23_v26, %v27_v28 }
  0x20   :  { %954 = vmatpush3.bf16.msra.mxu0 %v1081_v30  ;;  %v852_v30 = vcombine.low %v22_v24, %v26_v25 }
  0x21   :  { %982 = vmatpush3.bf16.msra.mxu1 %v1082_v31  ;;  %995 = vmatprep.subr.bf16.mxu0 %v1083_v40  ;;  %v854_v31 = vcombine.low %v23_v26, %v27_v28 }
  0x22   :  { %1023 = vmatprep.subr.bf16.mxu1 %v1084_v41 }
  0x23   :  { %653 = vmatmul.mubr.bf16.vlgmr.msra.gmra.mxu0 %v840_v35 }
  0x24   :  { %702 = vmatmul.mubr.bf16.vlgmr.msra.gmra.mxu1 %v842_v38  ;;  %996 = vmatpush3.bf16.msra.mxu0 %v1085_v42 }
  0x25   :  { %1024 = vmatpush3.bf16.msra.mxu1 %v1086_v43  ;;  %997 = vmatprep.subr.bf16.mxu0 %v1087_v44 }
  0x26   :  { %1025 = vmatprep.subr.bf16.mxu1 %v1088_v45  ;;  %660 = vmatprep.mubr.bf16.mxu0 %v849_v60 }
  0x27   :  { %709 = vmatprep.mubr.bf16.mxu1 %v851_v0 }
  0x28   :  { %998 = vmatpush3.bf16.msra.mxu0 %v1089_v46 }
  0x29   :  { %1026 = vmatpush3.bf16.msra.mxu1 %v1090_v47  ;;  %999 = vmatprep.subr.bf16.mxu0 %v1091_v48 }
  0x2a   :  { %1027 = vmatprep.subr.bf16.mxu1 %v1092_v49 }
  0x2b   :  { %661 = vmatmul.mubr.bf16.gmra.mxu0 %v848_v63 }
  0x2c   :  { %1000 = vmatpush3.bf16.msra.mxu0 %v1093_v50  ;;  %710 = vmatmul.mubr.bf16.gmra.mxu1 %v850_v2 }
  0x2d   :  { %1028 = vmatpush3.bf16.msra.mxu1 %v1094_v51  ;;  %1001 = vmatprep.subr.bf16.mxu0 %v1095_v52 }
  0x2e   :  { %1029 = vmatprep.subr.bf16.mxu1 %v1096_v53  ;;  %750 = vmatprep.mubr.bf16.mxu0 %v845_v21 }
  0x2f   :  { %799 = vmatprep.mubr.bf16.mxu1 %v847_v23 }
  0x30   :  { %1002 = vmatpush3.bf16.msra.mxu0 %v1097_v54 }
  0x31   :  { %1030 = vmatpush3.bf16.msra.mxu1 %v1098_v55  ;;  %1003 = vmatprep.subr.bf16.mxu0 %v1099_v56 }
  0x32   :  { %1031 = vmatprep.subr.bf16.mxu1 %v1100_v57 }
  0x34   :  { %1004 = vmatpush3.bf16.msra.mxu0 %v1101_v1 }
  0x35   :  { %1032 = vmatpush3.bf16.msra.mxu1 %v1102_v3  ;;  %1005 = vmatprep.subr.bf16.mxu0 %v1103_v4 }
  0x36   :  { %1033 = vmatprep.subr.bf16.mxu1 %v1104_v5 }
  0x38   :  { %1006 = vmatpush3.bf16.msra.mxu0 %v1105_v6 }
  0x39   :  { %1034 = vmatpush3.bf16.msra.mxu1 %v1106_v7  ;;  %1007 = vmatprep.subr.bf16.mxu0 %v1107_v8 }
  0x3a   :  { %1035 = vmatprep.subr.bf16.mxu1 %v1108_v9 }
  0x3c   :  { %1008 = vmatpush3.bf16.msra.mxu0 %v1109_v10 }
  0x3d   :  { %1036 = vmatpush3.bf16.msra.mxu1 %v1110_v11  ;;  %1009 = vmatprep.subr.bf16.mxu0 %v1111_v12 }
  0x3e   :  { %1037 = vmatprep.subr.bf16.mxu1 %v1112_v13 }
  0x40   :  { %1010 = vmatpush3.bf16.msra.mxu0 %v1113_v14 }
  0x41   :  { %1038 = vmatpush3.bf16.msra.mxu1 %v1114_v15 }
  0x43   :  { %751 = vmatmul.mubr.bf16.vlgmr.msra.gmra.mxu0 %v844_v20 }
  0x44   :  { %800 = vmatmul.mubr.bf16.vlgmr.msra.gmra.mxu1 %v846_v22  ;;  %758 = vmatprep.mubr.bf16.mxu0 %v853_v27 }
  0x45   :  { %807 = vmatprep.mubr.bf16.mxu1 %v855_v29 }
  0x4b   :  { %759 = vmatmul.mubr.bf16.gmra.mxu0 %v852_v30 }
  0x4c   :  { %808 = vmatmul.mubr.bf16.gmra.mxu1 %v854_v31 }
  0xe3   :  { %v955_v32 = vpop.f32.mrf.mxu0 }
  0xe4   :  { %v983_v33 = vpop.f32.mrf.mxu1 }
  0xe5   :  { %v956_v34 = vpop.f32.mrf.mxu0 }
  0xe6   :  { %v984_v35 = vpop.f32.mrf.mxu1  ;;  %v957_v50 = vadd.f32 %v956_v34, %v955_v32 }
  0xe7   :  { %v958_v36 = vpop.f32.mrf.mxu0  ;;  %v985_v51 = vadd.f32 %v984_v35, %v983_v33 }
  0xe8   :  { %v986_v37 = vpop.f32.mrf.mxu1 }
  0xe9   :  { %v959_v38 = vpop.f32.mrf.mxu0  ;;  %v704_v59 = vadd.f32 %v985_v51, %v957_v50 }
  0xea   :  { %v987_v39 = vpop.f32.mrf.mxu1  ;;  %v960_v54 = vadd.f32 %v959_v38, %v958_v36 }
  0xeb   :  { %v961_v40 = vpop.f32.mrf.mxu0  ;;  %v988_v55 = vadd.f32 %v987_v39, %v986_v37 }
  0xec   :  { %v989_v41 = vpop.f32.mrf.mxu1 }
  0xed   :  { %v962_v42 = vpop.f32.mrf.mxu0  ;;  %v707_v62 = vadd.f32 %v988_v55, %v960_v54 }
  0xee   :  { %v990_v43 = vpop.f32.mrf.mxu1  ;;  %v963_v1 = vadd.f32 %v962_v42, %v961_v40 }
  0xef   :  { %v964_v44 = vpop.f32.mrf.mxu0  ;;  %v991_v4 = vadd.f32 %v990_v43, %v989_v41 }
  0xf0   :  { %v992_v45 = vpop.f32.mrf.mxu1 }
  0xf1   :  { %v965_v46 = vpop.f32.mrf.mxu0  ;;  %v712_v17 = vadd.f32 %v991_v4, %v963_v1 }
  0xf2   :  { %v993_v47 = vpop.f32.mrf.mxu1  ;;  %v966_v8 = vadd.f32 %v965_v46, %v964_v44 }
  0xf3   :  { %v994_v11 = vadd.f32 %v993_v47, %v992_v45 }
  0xf5   :  { %v715_v21 = vadd.f32 %v994_v11, %v966_v8 }
 0x103   :  { %v1011_v48 = vpop.f32.mrf.mxu0 }
 0x104   :  { %v1039_v49 = vpop.f32.mrf.mxu1 }
 0x105   :  { %v1012_v52 = vpop.f32.mrf.mxu0 }
 0x106   :  { %v1040_v53 = vpop.f32.mrf.mxu1  ;;  %v1013_v56 = vadd.f32 %v1012_v52, %v1011_v48 }
 0x107   :  { %v1014_v57 = vpop.f32.mrf.mxu0  ;;  %v1041_v5 = vadd.f32 %v1040_v53, %v1039_v49 }
 0x108   :  { %v1042_v58 = vpop.f32.mrf.mxu1  ;;  %v753_v63 = vadd.f32 %v1013_v56, %v704_v59 }
 0x109   :  { %v1015_v60 = vpop.f32.mrf.mxu0 }
 0x10a   :  { %v1043_v61 = vpop.f32.mrf.mxu1  ;;  %v1016_v0 = vadd.f32 %v1015_v60, %v1014_v57  ;;  %v802_v12 = vadd.f32 %v1041_v5, %v753_v63 }
 0x10b   :  { %v1017_v2 = vpop.f32.mrf.mxu0  ;;  %v1044_v7 = vadd.f32 %v1043_v61, %v1042_v58 }
 0x10c   :  { %v1045_v3 = vpop.f32.mrf.mxu1  ;;  %v756_v6 = vadd.f32 %v1016_v0, %v707_v62 }
 0x10d   :  { %v1018_v9 = vpop.f32.mrf.mxu0 }
 0x10e   :  { %v1046_v10 = vpop.f32.mrf.mxu1  ;;  %v805_v13 = vadd.f32 %v1044_v7, %v756_v6  ;;  %v1019_v14 = vadd.f32 %v1018_v9, %v1017_v2 }
 0x10f   :  { %v1020_v15 = vpop.f32.mrf.mxu0  ;;  %v1047_v24 = vadd.f32 %v1046_v10, %v1045_v3 }
 0x110   :  { %v1048_v16 = vpop.f32.mrf.mxu1  ;;  %v931_v18 = vpack.c.bf16 %v805_v13, %v802_v12  ;;  %v761_v22 = vadd.f32 %v1019_v14, %v712_v17 }
 0x111   :  { %v1021_v19 = vpop.f32.mrf.mxu0 }
 0x112   :  { %v1049_v20 = vpop.f32.mrf.mxu1  ;;  %932 = vst [vmem:[%s1378_s2] sm:$0xff] %v931_v18   ;;  %v1022_v23 = vadd.f32 %v1021_v19, %v1020_v15  ;;  %v810_v27 = vadd.f32 %v1047_v24, %v761_v22 }
 0x113   :  { %v1050_v26 = vadd.f32 %v1049_v20, %v1048_v16 }
 0x114   :  { %v764_v25 = vadd.f32 %v1022_v23, %v715_v21 }
 0x116   :  { %v813_v28 = vadd.f32 %v1050_v26, %v764_v25 }
 0x118   :  { %v936_v29 = vpack.c.bf16 %v813_v28, %v810_v27 }
 0x11a   :  { %938 = vst [vmem:[%s1378_s2 + $0x8] sm:$0xff] %v936_v29  }

// kernel: discriminator_forward.7
= control target key start
LH: loop header
LB: loop body
LE: loop exit
PB: predicated region body
PF: predicated region fallthrough
CT: control target
= control target key end

     0   :  { %v45_v0 = vlaneseq  ;;  %vm160_vm0 = vcmask 7168   ;;  %s224_s0 = inlined_call_operand.vmem [shape: bf16[16,1024], index: 0, kind: input, shape index: {}]   ;;  %s225_s1 = inlined_call_operand.vmem [shape: bf16[1,1024], index: 1, kind: input, shape index: {}]   ;;  %s226_s2 = inlined_call_operand.<no memory space> [shape: f32[1,1], index: 2, kind: input, shape index: {}]   ;;  %s227_s3 = inlined_call_operand.vmem [shape: f32[16,1], index: 3, kind: output, shape index: {}]  }
   0x1   :  { %v8_v1 = vstv %s226_s2  ;;  %v16_v2 = vld [vmem:[%s224_s0] sm:$0xff]  ;;  %v17_v4 = vld [vmem:[%s224_s0 + $0x8] sm:$0xff]  ;;  %v18_v19 = vld [vmem:[%s224_s0 + $0x10] sm:$0xff] }
   0x2   :  { %v40_v3 = vld [vmem:[%s225_s1] sm:$0xff]  ;;  %9 = vst [vmem:[#allocation2] sm:$0x1] %v8_v1  ;;  %v46_v6 = vshrl.u32 %v45_v0, 7  ;;  %v24_v8 = vunpack.c.l.bf16 %v16_v2  ;;  %v21_v14 = vld [vmem:[%s224_s0 + $0x28] sm:$0xff]  ;;  %v25_v15 = vunpack.c.h.bf16 %v16_v2  ;;  %v26_v16 = vunpack.c.l.bf16 %v17_v4  ;;  %v22_v32 = vld [vmem:[%s224_s0 + $0x30] sm:$0xff] }
   0x3   :  { %v41_v5 = vunpack.c.l.bf16 %v40_v3  ;;  %v20_v7 = vld [vmem:[%s224_s0 + $0x20] sm:$0xff]  ;;  %v42_v9 = vunpack.c.h.bf16 %v40_v3  ;;  %v27_v17 = vunpack.c.h.bf16 %v17_v4  ;;  %v34_v27 = vunpack.c.l.bf16 %v21_v14  ;;  %v19_v37 = vld [vmem:[%s224_s0 + $0x18] sm:$0xff] }
   0x4   :  { %v47_v10 = vsub.s32 0, %v46_v6  ;;  %v51_v11 = vsub.s32 2, %v46_v6  ;;  %v55_v12 = vsub.s32 4, %v46_v6  ;;  %v59_v13 = vsub.s32 6, %v46_v6  ;;  %v23_v47 = vld [vmem:[%s224_s0 + $0x38] sm:$0xff] }
   0x5   :  { %v32_v18 = vunpack.c.l.bf16 %v20_v7  ;;  %v33_v26 = vunpack.c.h.bf16 %v20_v7  ;;  %v28_v33 = vunpack.c.l.bf16 %v18_v19  ;;  %v29_v34 = vunpack.c.h.bf16 %v18_v19 }
   0x6   :  { %v48_v20 = vrot.slane %v41_v5, %v47_v10  ;;  %v52_v21 = vrot.slane %v41_v5, %v51_v11  ;;  %v56_v22 = vrot.slane %v41_v5, %v55_v12  ;;  %v60_v23 = vrot.slane %v41_v5, %v59_v13 }
   0x7   :  { %v64_v24 = vrot.slane %v42_v9, %v47_v10  ;;  %v68_v25 = vrot.slane %v42_v9, %v51_v11  ;;  %v72_v35 = vrot.slane %v42_v9, %v55_v12  ;;  %v35_v36 = vunpack.c.h.bf16 %v21_v14 }
   0x8   :  { %v88_v28 = vrot.slane %v48_v20, %v47_v10  ;;  %v92_v29 = vrot.slane %v52_v21, %v47_v10  ;;  %v96_v30 = vrot.slane %v56_v22, %v47_v10  ;;  %v100_v31 = vrot.slane %v60_v23, %v47_v10 }
   0x9   :  { %v104_v38 = vrot.slane %v64_v24, %v47_v10  ;;  %v76_v42 = vrot.slane %v42_v9, %v59_v13  ;;  %v108_v43 = vrot.slane %v68_v25, %v47_v10  ;;  %v36_v45 = vunpack.c.l.bf16 %v22_v32 }
   0xa   :  { %v117_v39 = vmul.f32 %v88_v28, %v24_v8  ;;  %v118_v40 = vmul.f32 %v92_v29, %v25_v15  ;;  %v119_v41 = vmul.f32 %v96_v30, %v26_v16  ;;  %v120_v44 = vmul.f32 %v100_v31, %v27_v17  ;;  %v167_v16 = vld [vmem:[#allocation2] ss:$0 sm:$0xff] }
   0xb   :  { %v125_v48 = vmul.f32 %v88_v28, %v32_v18  ;;  %v126_v49 = vmul.f32 %v92_v29, %v33_v26  ;;  %v127_v50 = vmul.f32 %v96_v30, %v34_v27  ;;  %v30_v51 = vunpack.c.l.bf16 %v19_v37 }
   0xc   :  { %v133_v46 = vadd.f32 %v118_v40, %v117_v39  ;;  %v112_v52 = vrot.slane %v72_v35, %v47_v10  ;;  %v37_v53 = vunpack.c.h.bf16 %v22_v32  ;;  %v121_v54 = vmul.f32 %v104_v38, %v28_v33 }
   0xd   :  { %v128_v56 = vmul.f32 %v100_v31, %v35_v36  ;;  %v142_v57 = vadd.f32 %v126_v49, %v125_v48  ;;  %v31_v58 = vunpack.c.h.bf16 %v19_v37  ;;  %v116_v59 = vrot.slane %v76_v42, %v47_v10 }
   0xe   :  { %v134_v55 = vadd.f32 %v133_v46, %v119_v41  ;;  %v38_v60 = vunpack.c.l.bf16 %v23_v47  ;;  %v122_v61 = vmul.f32 %v108_v43, %v29_v34  ;;  %v129_v63 = vmul.f32 %v104_v38, %v36_v45 }
   0xf   :  { %v143_v0 = vadd.f32 %v142_v57, %v127_v50  ;;  %v39_v1 = vunpack.c.h.bf16 %v23_v47  ;;  %v123_v2 = vmul.f32 %v112_v52, %v30_v51  ;;  %v130_v4 = vmul.f32 %v108_v43, %v37_v53 }
  0x10   :  { %v135_v62 = vadd.f32 %v134_v55, %v120_v44  ;;  %v124_v6 = vmul.f32 %v116_v59, %v31_v58  ;;  %v131_v8 = vmul.f32 %v112_v52, %v38_v60 }
  0x11   :  { %v144_v5 = vadd.f32 %v143_v0, %v128_v56  ;;  %v132_v12 = vmul.f32 %v116_v59, %v39_v1 }
  0x12   :  { %v136_v3 = vadd.f32 %v135_v62, %v121_v54 }
  0x13   :  { %v145_v9 = vadd.f32 %v144_v5, %v129_v63 }
  0x14   :  { %v137_v7 = vadd.f32 %v136_v3, %v122_v61 }
  0x15   :  { %v146_v13 = vadd.f32 %v145_v9, %v130_v4 }
  0x16   :  { %v138_v11 = vadd.f32 %v137_v7, %v123_v2 }
  0x17   :  { %v147_v15 = vadd.f32 %v146_v13, %v131_v8 }
  0x18   :  { %v139_v14 = vadd.f32 %v138_v11, %v124_v6 }
  0x19   :  { %v148_v10 = vadd.f32 %v147_v15, %v132_v12 }
  0x1a   :  { %140 = vadd.xlane.f32.xlu0 %v139_v14 }
  0x1e   :  { %149 = vadd.xlane.f32.xlu0 %v148_v10 }
  0xa3   :  { %v141_v17 = vpop.xlane.xlu0 %140 }
  0xa4   :  { %v158_v18 = vadd.f32 %v167_v16, %v141_v17 }
  0xa6   :  { %161 = vst.msk [vmem:[%s227_s3] sm:$0xff] %vm160_vm0, %v158_v18 }
  0xa7   :  { %v150_v19 = vpop.xlane.xlu0 %149 }
  0xa8   :  { %v159_v20 = vadd.f32 %v167_v16, %v150_v19 }
  0xaa   :  { %162 = vst.msk [vmem:[%s227_s3 + $0x8] sm:$0xff] %vm160_vm0, %v159_v20 }

</bundles_post_ra>
